<compile_context>
chip_gen: v7x
topology: tpu7x:2x2x1
jax: 0.10.0
libtpu: 0.0.40
codegen_flags: <defaults>
</compile_context>

<pallas_src>
import functools
import math

import jax
import jax.numpy as jnp
from jax import lax
from jax.experimental import pallas as pl
from jax.experimental.pallas import tpu as pltpu


def _head_kernel(x_ref, wp_ref, w_ref, b6_ref, o_ref, *, dx, dw):
    """x_ref: (B, dx), wp_ref: (B, dw), w_ref: (dx+dw+2, 128) = [w5; b5; w6^T],
    b6_ref: (1, 1) in SMEM, o_ref: (B, 1)."""
    eps = 1e-5
    inv_sqrt2 = 1.0 / math.sqrt(2.0)
    D = dx + dw

    x = x_ref[...]    # (B, dx) f32
    wp = wp_ref[...]  # (B, dw) f32

    # bn4 (training-mode batch norm, gamma=1, beta=0), decomposed per feature
    # block since BN statistics are per-feature.
    mu_x = jnp.mean(x, axis=0, keepdims=True)
    var_x = jnp.mean((x - mu_x) * (x - mu_x), axis=0, keepdims=True)
    xn = (x - mu_x) * lax.rsqrt(var_x + eps)

    mu_w = jnp.mean(wp, axis=0, keepdims=True)
    var_w = jnp.mean((wp - mu_w) * (wp - mu_w), axis=0, keepdims=True)
    wn = (wp - mu_w) * lax.rsqrt(var_w + eps)

    # fc5 split across the two feature blocks:
    #   feats @ w5 == xn @ w5[:dx] + wn @ w5[dx:]
    h = (
        jnp.dot(xn, w_ref[0:dx, :], preferred_element_type=jnp.float32)
        + jnp.dot(wn, w_ref[dx:D, :], preferred_element_type=jnp.float32)
        + w_ref[D:D + 1, :]  # b5 row
    )

    # Exact GELU (erf formulation, matches F.gelu(approximate='none')).
    h = 0.5 * h * (1.0 + lax.erf(h * inv_sqrt2))

    # bn5 folded into fc6 (VPU multiply + lane reduce, no MXU N=1 matmul):
    #   hn @ w6 + b6 == sum(h * scale, -1) + (b6 - sum(mu2 * scale))
    # with scale = w6 * rsqrt(var2 + eps).
    mu2 = jnp.mean(h, axis=0, keepdims=True)
    var2 = jnp.mean((h - mu2) * (h - mu2), axis=0, keepdims=True)
    scale = w_ref[D + 1:D + 2, :] * lax.rsqrt(var2 + eps)  # (1, 128)
    bias = b6_ref[0, 0] - jnp.sum(mu2 * scale)
    o_ref[...] = jnp.sum(h * scale, axis=1, keepdims=True) + bias


def waytu_selection_head(x, waypoint_positions, waypoint_quaternions, params):
    """Wrapper: only the tiny (B, 7W) waypoint slab is built outside the kernel;
    the big (B, D) feature concat is avoided by splitting fc5 in-kernel."""
    w_packed, b6 = params
    B = waypoint_positions.shape[0]

    # cat((pos, quat), -1).view(B, -1): ~2 KB, cheap; keeps w5's row ordering.
    wpts = jnp.concatenate(
        (waypoint_positions, waypoint_quaternions), axis=-1
    ).reshape(B, -1)

    x = x.astype(jnp.float32)
    wpts = wpts.astype(jnp.float32)
    dx = x.shape[1]
    dw = wpts.shape[1]
    assert w_packed.shape[0] == dx + dw + 2, (w_packed.shape, dx, dw)

    kernel = functools.partial(_head_kernel, dx=dx, dw=dw)

    out = pl.pallas_call(
        kernel,
        out_shape=jax.ShapeDtypeStruct((B, 1), jnp.float32),
        in_specs=[
            pl.BlockSpec(memory_space=pltpu.MemorySpace.VMEM),  # x
            pl.BlockSpec(memory_space=pltpu.MemorySpace.VMEM),  # waypoint slab
            pl.BlockSpec(memory_space=pltpu.MemorySpace.VMEM),  # [w5; b5; w6^T]
            pl.BlockSpec(memory_space=pltpu.MemorySpace.SMEM),  # b6 scalar
        ],
        out_specs=pl.BlockSpec(memory_space=pltpu.MemorySpace.VMEM),
    )(x, wpts, w_packed, b6)
    return out


def init_params(key, num_waypoints, dx=256, hidden=128):
    """Deterministic xavier_normal_ weights, zero biases (matches __init__).
    Weights are packed ONCE into a single (D+2, 128) block: rows [0,D)=w5
    (stored (in,out) i.e. transposed vs PyTorch), row D = b5, row D+1 = w6^T."""
    D = dx + 7 * num_waypoints
    k5, k6 = jax.random.split(key)

    def xavier_normal(k, fan_in, fan_out):
        std = math.sqrt(2.0 / (fan_in + fan_out))
        return std * jax.random.normal(k, (fan_in, fan_out), dtype=jnp.float32)

    w5 = xavier_normal(k5, D, hidden)                     # (D, 128)
    b5 = jnp.zeros((1, hidden), dtype=jnp.float32)        # (1, 128)
    w6 = xavier_normal(k6, hidden, 1)                     # (128, 1)
    b6 = jnp.zeros((1, 1), dtype=jnp.float32)             # (1, 1) -> SMEM

    w_packed = jnp.concatenate([w5, b5, w6.T], axis=0)    # (D+2, 128)
    return (w_packed, b6)


def reference_forward(x, waypoint_positions, waypoint_quaternions, params):
    """Pure-JAX reference of the PyTorch forward (training-mode BN)."""
    eps = 1e-5
    w_packed, b6 = params
    D = w_packed.shape[0] - 2
    w5 = w_packed[:D]            # (D, 128)
    b5 = w_packed[D:D + 1]       # (1, 128)
    w6 = w_packed[D + 1:D + 2].T  # (128, 1)

    B = waypoint_positions.shape[0]
    wpts = jnp.concatenate(
        (waypoint_positions, waypoint_quaternions), axis=-1
    ).reshape(B, -1)
    feats = jnp.concatenate((x, wpts), axis=1).astype(jnp.float32)

    mu = feats.mean(axis=0, keepdims=True)
    var = ((feats - mu) ** 2).mean(axis=0, keepdims=True)
    xn = (feats - mu) / jnp.sqrt(var + eps)

    h = xn @ w5 + b5
    h = 0.5 * h * (1.0 + lax.erf(h / math.sqrt(2.0)))

    mu2 = h.mean(axis=0, keepdims=True)
    var2 = ((h - mu2) ** 2).mean(axis=0, keepdims=True)
    hn = (h - mu2) / jnp.sqrt(var2 + eps)

    return hn @ w6 + b6


if __name__ == "__main__":
    num_waypoints = 8
    B = 8

    key = jax.random.PRNGKey(0)
    kx, kp, kq, kw = jax.random.split(key, 4)

    x = jax.random.normal(kx, (B, 256), dtype=jnp.float32)
    waypoint_positions = jax.random.normal(kp, (B, num_waypoints, 3), dtype=jnp.float32)
    waypoint_quaternions = jax.random.normal(kq, (B, num_waypoints, 4), dtype=jnp.float32)

    params = init_params(kw, num_waypoints)

    out = waytu_selection_head(x, waypoint_positions, waypoint_quaternions, params)
    out = jax.block_until_ready(out)

    ref = reference_forward(x, waypoint_positions, waypoint_quaternions, params)
    assert out.shape == (B, 1), out.shape
    assert jnp.allclose(out, ref, atol=1e-4, rtol=1e-4), (out, ref)

    print("KERNEL_OK")
</pallas_src>

<mosaic_0001>
module attributes {stable_mosaic.version = 11 : i64} {
  func.func @_head_kernel(%arg0: memref<8x256xf32, #tpu.memory_space<vmem>>, %arg1: memref<8x56xf32, #tpu.memory_space<vmem>>, %arg2: memref<314x128xf32, #tpu.memory_space<vmem>>, %arg3: memref<1x1xf32, #tpu.memory_space<smem>>, %arg4: memref<8x1xf32, #tpu.memory_space<vmem>>) attributes {dimension_semantics = [], scalar_prefetch = 0 : i64, scratch_operands = 0 : i64, tpu.core_type = #tpu.core_type<tc>} {
    %c0 = arith.constant 0 : index
    %c0_0 = arith.constant 0 : index
    %0 = vector.load %arg0[%c0, %c0_0] : memref<8x256xf32, #tpu.memory_space<vmem>>, vector<8x256xf32>
    %c0_1 = arith.constant 0 : index
    %c0_2 = arith.constant 0 : index
    %1 = vector.load %arg1[%c0_1, %c0_2] : memref<8x56xf32, #tpu.memory_space<vmem>>, vector<8x56xf32>
    %cst = arith.constant dense<0.000000e+00> : vector<256xf32>
    %2 = vector.multi_reduction <add>, %0, %cst [0] : vector<8x256xf32> to vector<256xf32>
    %3 = vector.shape_cast %2 : vector<256xf32> to vector<1x256xf32>
    %cst_3 = arith.constant 8.000000e+00 : f32
    %4 = vector.broadcast %cst_3 : f32 to vector<1x256xf32>
    %5 = arith.divf %3, %4 : vector<1x256xf32>
    %6 = vector.broadcast %5 : vector<1x256xf32> to vector<8x256xf32>
    %7 = arith.subf %0, %6 : vector<8x256xf32>
    %8 = vector.broadcast %5 : vector<1x256xf32> to vector<8x256xf32>
    %9 = arith.subf %0, %8 : vector<8x256xf32>
    %10 = arith.mulf %7, %9 : vector<8x256xf32>
    %cst_4 = arith.constant dense<0.000000e+00> : vector<256xf32>
    %11 = vector.multi_reduction <add>, %10, %cst_4 [0] : vector<8x256xf32> to vector<256xf32>
    %12 = vector.shape_cast %11 : vector<256xf32> to vector<1x256xf32>
    %cst_5 = arith.constant 8.000000e+00 : f32
    %13 = vector.broadcast %cst_5 : f32 to vector<1x256xf32>
    %14 = arith.divf %12, %13 : vector<1x256xf32>
    %15 = vector.broadcast %5 : vector<1x256xf32> to vector<8x256xf32>
    %16 = arith.subf %0, %15 : vector<8x256xf32>
    %cst_6 = arith.constant 9.99999974E-6 : f32
    %17 = vector.broadcast %cst_6 : f32 to vector<1x256xf32>
    %18 = arith.addf %14, %17 : vector<1x256xf32>
    %19 = math.rsqrt %18 : vector<1x256xf32>
    %20 = vector.broadcast %19 : vector<1x256xf32> to vector<8x256xf32>
    %21 = arith.mulf %16, %20 : vector<8x256xf32>
    %cst_7 = arith.constant dense<0.000000e+00> : vector<56xf32>
    %22 = vector.multi_reduction <add>, %1, %cst_7 [0] : vector<8x56xf32> to vector<56xf32>
    %23 = vector.shape_cast %22 : vector<56xf32> to vector<1x56xf32>
    %cst_8 = arith.constant 8.000000e+00 : f32
    %24 = vector.broadcast %cst_8 : f32 to vector<1x56xf32>
    %25 = arith.divf %23, %24 : vector<1x56xf32>
    %26 = vector.broadcast %25 : vector<1x56xf32> to vector<8x56xf32>
    %27 = arith.subf %1, %26 : vector<8x56xf32>
    %28 = vector.broadcast %25 : vector<1x56xf32> to vector<8x56xf32>
    %29 = arith.subf %1, %28 : vector<8x56xf32>
    %30 = arith.mulf %27, %29 : vector<8x56xf32>
    %cst_9 = arith.constant dense<0.000000e+00> : vector<56xf32>
    %31 = vector.multi_reduction <add>, %30, %cst_9 [0] : vector<8x56xf32> to vector<56xf32>
    %32 = vector.shape_cast %31 : vector<56xf32> to vector<1x56xf32>
    %cst_10 = arith.constant 8.000000e+00 : f32
    %33 = vector.broadcast %cst_10 : f32 to vector<1x56xf32>
    %34 = arith.divf %32, %33 : vector<1x56xf32>
    %35 = vector.broadcast %25 : vector<1x56xf32> to vector<8x56xf32>
    %36 = arith.subf %1, %35 : vector<8x56xf32>
    %cst_11 = arith.constant 9.99999974E-6 : f32
    %37 = vector.broadcast %cst_11 : f32 to vector<1x56xf32>
    %38 = arith.addf %34, %37 : vector<1x56xf32>
    %39 = math.rsqrt %38 : vector<1x56xf32>
    %40 = vector.broadcast %39 : vector<1x56xf32> to vector<8x56xf32>
    %41 = arith.mulf %36, %40 : vector<8x56xf32>
    %c0_12 = arith.constant 0 : index
    %c0_13 = arith.constant 0 : index
    %42 = vector.load %arg2[%c0_12, %c0_13] : memref<314x128xf32, #tpu.memory_space<vmem>>, vector<256x128xf32>
    %cst_14 = arith.constant dense<0.000000e+00> : vector<8x128xf32>
    %43 = tpu.matmul %21, %42, %cst_14 {dimension_numbers = #tpu.dot_dimension_numbers<[1], [0], [0], [1], [0, 0, 1, 1], [], []>} : vector<8x256xf32>, vector<256x128xf32>, vector<8x128xf32> -> vector<8x128xf32>
    %c256 = arith.constant 256 : index
    %c0_15 = arith.constant 0 : index
    %44 = vector.load %arg2[%c256, %c0_15] : memref<314x128xf32, #tpu.memory_space<vmem>>, vector<56x128xf32>
    %cst_16 = arith.constant dense<0.000000e+00> : vector<8x128xf32>
    %45 = tpu.matmul %41, %44, %cst_16 {dimension_numbers = #tpu.dot_dimension_numbers<[1], [0], [0], [1], [0, 0, 1, 1], [], []>} : vector<8x56xf32>, vector<56x128xf32>, vector<8x128xf32> -> vector<8x128xf32>
    %46 = arith.addf %43, %45 : vector<8x128xf32>
    %c312 = arith.constant 312 : index
    %c0_17 = arith.constant 0 : index
    %47 = vector.load %arg2[%c312, %c0_17] : memref<314x128xf32, #tpu.memory_space<vmem>>, vector<1x128xf32>
    %48 = vector.broadcast %47 : vector<1x128xf32> to vector<8x128xf32>
    %49 = arith.addf %46, %48 : vector<8x128xf32>
    %cst_18 = arith.constant 5.000000e-01 : f32
    %50 = vector.broadcast %cst_18 : f32 to vector<8x128xf32>
    %51 = arith.mulf %50, %49 : vector<8x128xf32>
    %cst_19 = arith.constant 0.707106769 : f32
    %52 = vector.broadcast %cst_19 : f32 to vector<8x128xf32>
    %53 = arith.mulf %49, %52 : vector<8x128xf32>
    %54 = math.erf %53 : vector<8x128xf32>
    %cst_20 = arith.constant 1.000000e+00 : f32
    %55 = vector.broadcast %cst_20 : f32 to vector<8x128xf32>
    %56 = arith.addf %55, %54 : vector<8x128xf32>
    %57 = arith.mulf %51, %56 : vector<8x128xf32>
    %cst_21 = arith.constant dense<0.000000e+00> : vector<128xf32>
    %58 = vector.multi_reduction <add>, %57, %cst_21 [0] : vector<8x128xf32> to vector<128xf32>
    %59 = vector.shape_cast %58 : vector<128xf32> to vector<1x128xf32>
    %cst_22 = arith.constant 8.000000e+00 : f32
    %60 = vector.broadcast %cst_22 : f32 to vector<1x128xf32>
    %61 = arith.divf %59, %60 : vector<1x128xf32>
    %62 = vector.broadcast %61 : vector<1x128xf32> to vector<8x128xf32>
    %63 = arith.subf %57, %62 : vector<8x128xf32>
    %64 = vector.broadcast %61 : vector<1x128xf32> to vector<8x128xf32>
    %65 = arith.subf %57, %64 : vector<8x128xf32>
    %66 = arith.mulf %63, %65 : vector<8x128xf32>
    %cst_23 = arith.constant dense<0.000000e+00> : vector<128xf32>
    %67 = vector.multi_reduction <add>, %66, %cst_23 [0] : vector<8x128xf32> to vector<128xf32>
    %68 = vector.shape_cast %67 : vector<128xf32> to vector<1x128xf32>
    %cst_24 = arith.constant 8.000000e+00 : f32
    %69 = vector.broadcast %cst_24 : f32 to vector<1x128xf32>
    %70 = arith.divf %68, %69 : vector<1x128xf32>
    %c313 = arith.constant 313 : index
    %c0_25 = arith.constant 0 : index
    %71 = vector.load %arg2[%c313, %c0_25] : memref<314x128xf32, #tpu.memory_space<vmem>>, vector<1x128xf32>
    %cst_26 = arith.constant 9.99999974E-6 : f32
    %72 = vector.broadcast %cst_26 : f32 to vector<1x128xf32>
    %73 = arith.addf %70, %72 : vector<1x128xf32>
    %74 = math.rsqrt %73 : vector<1x128xf32>
    %75 = arith.mulf %71, %74 : vector<1x128xf32>
    %c0_27 = arith.constant 0 : index
    %c0_28 = arith.constant 0 : index
    %76 = memref.load %arg3[%c0_27, %c0_28] : memref<1x1xf32, #tpu.memory_space<smem>>
    %77 = arith.mulf %61, %75 : vector<1x128xf32>
    %78 = vector.shape_cast %77 : vector<1x128xf32> to vector<1x1x128xf32>
    %cst_29 = arith.constant dense<0.000000e+00> : vector<1xf32>
    %79 = vector.multi_reduction <add>, %78, %cst_29 [1, 2] : vector<1x1x128xf32> to vector<1xf32>
    %80 = vector.shape_cast %79 : vector<1xf32> to vector<1x1x1xf32>
    %81 = vector.extract %80[0, 0, 0] : f32 from vector<1x1x1xf32>
    %82 = arith.subf %76, %81 : f32
    %83 = vector.broadcast %75 : vector<1x128xf32> to vector<8x128xf32>
    %84 = arith.mulf %57, %83 : vector<8x128xf32>
    %cst_30 = arith.constant dense<0.000000e+00> : vector<8xf32>
    %85 = vector.multi_reduction <add>, %84, %cst_30 [1] : vector<8x128xf32> to vector<8xf32>
    %86 = vector.shape_cast %85 : vector<8xf32> to vector<8x1xf32>
    %87 = vector.broadcast %82 : f32 to vector<8x1xf32>
    %88 = arith.addf %86, %87 : vector<8x1xf32>
    %c0_31 = arith.constant 0 : index
    %c0_32 = arith.constant 0 : index
    %89 = vector.load %arg4[%c0_31, %c0_32] : memref<8x1xf32, #tpu.memory_space<vmem>>, vector<8x1xf32>
    tpu.vector_store %arg4[%c0_31, %c0_32], %88 {strides = array<i32>} : memref<8x1xf32, #tpu.memory_space<vmem>>, vector<8x1xf32>,
    return
  }
}

</mosaic_0001>

<bundles_post_ra>
// kernel: tpu_custom_call.1
= control target key start
LH: loop header
LB: loop body
LE: loop exit
PB: predicated region body
PF: predicated region fallthrough
CT: control target
= control target key end

     0   :  { %10 = vsyncpa [#allocation4], 0  ;;  %s636_s0 = inlined_call_operand.hbm [shape: f32[8,256], index: 0, kind: input, shape index: {}]   ;;  %s637_s1 = inlined_call_operand.hbm [shape: f32[8,56], index: 1, kind: input, shape index: {}]   ;;  %s638_s2 = inlined_call_operand.hbm [shape: f32[314,128], index: 2, kind: input, shape index: {}]   ;;  %s639_s3 = inlined_call_operand.<no memory space> [shape: f32[1,1], index: 3, kind: input, shape index: {}]   ;;  %s640_s4 = inlined_call_operand.vmem [shape: f32[8,1], index: 4, kind: output, shape index: {}]  }
   0x1   :  { %11 = vsyncpa [#allocation6], 0  ;;  %s556_s15 = smov [#allocation5]   ;;  %s557_s17 = smov [#allocation3]  }
   0x2   :  { %s28_s16 = sshll.u32 %s556_s15, 4  ;;  %s18_s18 = sshll.u32 %s557_s17, 4  ;;  %s29_s16 = int_to_ptr.vmem [resolvable:$true] %s28_s16  ;;  %s19_s18 = int_to_ptr.vmem [resolvable:$true] %s18_s18 }
   0x3   :  { %s486_s21 = scalar_lea.hbm %s637_s1, 128 }
   0x4   :  { %p487_p0 = scmp.ne.s32.totalorder %s637_s1, %s486_s21  ;;  %p490_p1 = scmp.lt.u32.totalorder %s486_s21, %s637_s1 }
   0x6   :  { %p492_p2 = pnand %p490_p1, %p487_p0 }
   0x8   :  { %495 = shalt.err (!%p492_p2)
}
   0x9   :  { %s496_s26 = scalar_lea.vmem %s29_s16, 128  ;;  %p501_p4 = scmp.lt.s32.totalorder %s29_s16, %s29_s16 }
   0xa   :  { %p497_p3 = scmp.ne.s32.totalorder %s29_s16, %s496_s26  ;;  %p502_p5 = scmp.lt.s32.totalorder %s496_s26, %s496_s26 }
   0xc   :  { %p503_p6 = por %p502_p5, %p501_p4 }
   0xe   :  { %p504_p7 = pnand %p503_p6, %p497_p3 }
  0x10   :  { %507 = shalt.err (!%p504_p7)
}
  0x11   :  { %31 = dma.hbm_to_vmem [thread:$0]  %s637_s1, 128, %s29_s16, [#allocation6]  }
  0x12   :  { %s508_s5 = scalar_lea.hbm %s636_s0, 256 }
  0x13   :  { %p509_p8 = scmp.ne.s32.totalorder %s636_s0, %s508_s5  ;;  %p512_p9 = scmp.lt.u32.totalorder %s508_s5, %s636_s0 }
  0x15   :  { %p514_p10 = pnand %p512_p9, %p509_p8 }
  0x17   :  { %517 = shalt.err (!%p514_p10)
}
  0x18   :  { %s518_s10 = scalar_lea.vmem %s19_s18, 256  ;;  %p523_p12 = scmp.lt.s32.totalorder %s19_s18, %s19_s18 }
  0x19   :  { %p519_p11 = scmp.ne.s32.totalorder %s19_s18, %s518_s10  ;;  %p524_p13 = scmp.lt.s32.totalorder %s518_s10, %s518_s10 }
  0x1b   :  { %p525_p0 = por %p524_p13, %p523_p12 }
  0x1d   :  { %p526_p1 = pnand %p525_p0, %p519_p11 }
  0x1f   :  { %529 = shalt.err (!%p526_p1)
}
  0x20   :  { %21 = dma.hbm_to_vmem [thread:$0]  %s636_s0, 256, %s19_s18, [#allocation4]  }
  0x21   :  { %s558_s12 = smov [#allocation7]   ;;  %s530_s16 = scalar_lea.hbm %s638_s2, 5120 }
  0x22   :  { %s37_s13 = sshll.u32 %s558_s12, 4  ;;  %p531_p2 = scmp.ne.s32.totalorder %s638_s2, %s530_s16  ;;  %s38_s13 = int_to_ptr.vmem [resolvable:$true] %s37_s13 }
  0x23   :  { %p534_p3 = scmp.lt.u32.totalorder %s530_s16, %s638_s2 }
  0x25   :  { %p536_p4 = pnand %p534_p3, %p531_p2 }
  0x27   :  { %539 = shalt.err (!%p536_p4)
}
  0x28   :  { %s540_s22 = scalar_lea.vmem %s38_s13, 5120  ;;  %p545_p6 = scmp.lt.s32.totalorder %s38_s13, %s38_s13 }
  0x29   :  { %p541_p5 = scmp.ne.s32.totalorder %s38_s13, %s540_s22  ;;  %p546_p7 = scmp.lt.s32.totalorder %s540_s22, %s540_s22 }
  0x2b   :  { %p547_p8 = por %p546_p7, %p545_p6 }
  0x2d   :  { %p548_p9 = pnand %p547_p8, %p541_p5 }
  0x2f   :  { %551 = shalt.err (!%p548_p9)
}
  0x30   :  { %s559_s0 = smov 128   ;;  %s560_s18 = smov 8  }
  0x31   :  { %43 = dma.hbm_to_vmem [thread:$0]  %s638_s2, 5120, %s38_s13, [#allocation6], %s559_s0, %s559_s0, %s560_s18  }
  0x32   :  { %552 = dma.done.wait [#allocation4], 256  }
  0x33   :  { %553 = vsyncadd [#allocation4], 4294967040 }
  0x34   :  { %554 = dma.done.wait [#allocation6], 5248  }
  0x35   :  { %555 = vsyncadd [#allocation6], 4294962048  ;;  %v561_v0 = vmov 0.0|0.0   ;;  %vm562_vm0 = vmmov 0   ;;  %v563_v1 = vmov 0.0   ;;  %v135_v2 = vld [vmem:[#allocation7 + $0x80] sm:$0xff] }
  0x36   :  { %425 = vmatprep.subr.bf16.mxu0 %v561_v0  ;;  %422 = vmatprep.mubr.msk.f32.mxu0 %vm562_vm0, %v563_v1  ;;  %v136_v3 = vld [vmem:[#allocation7 + $0x88] sm:$0xff]  ;;  %v119_v4 = vld [vmem:[#allocation7] sm:$0xff]  ;;  %v137_v7 = vld [vmem:[#allocation7 + $0x90] sm:$0xff]  ;;  %vm97_vm1 = vcmask 457728   ;;  %vm334_vm2 = vcmask 1040384   ;;  %vm355_vm3 = vcmask 7168  }
  0x37   :  { %v434_v5 = vpack.c.bf16 %v136_v3, %v135_v2  ;;  %v120_v6 = vld [vmem:[#allocation7 + $0x8] sm:$0xff]  ;;  %v138_v8 = vld [vmem:[#allocation7 + $0x98] sm:$0xff]  ;;  %v121_v11 = vld [vmem:[#allocation7 + $0x10] sm:$0xff] }
  0x38   :  { %v436_v9 = vpack.c.bf16 %v120_v6, %v119_v4  ;;  %v438_v10 = vpack.c.bf16 %v138_v8, %v137_v7  ;;  %v122_v12 = vld [vmem:[#allocation7 + $0x18] sm:$0xff]  ;;  %v139_v13 = vld [vmem:[#allocation7 + $0xa0] sm:$0xff]  ;;  %v140_v14 = vld [vmem:[#allocation7 + $0xa8] sm:$0xff] }
  0x39   :  { %435 = vmatprep.subr.bf16.mxu1 %v434_v5  ;;  %v440_v15 = vpack.c.bf16 %v122_v12, %v121_v11  ;;  %v442_v16 = vpack.c.bf16 %v140_v14, %v139_v13  ;;  %v123_v17 = vld [vmem:[#allocation7 + $0x20] sm:$0xff]  ;;  %v124_v18 = vld [vmem:[#allocation7 + $0x28] sm:$0xff]  ;;  %v141_v19 = vld [vmem:[#allocation7 + $0xb0] sm:$0xff] }
  0x3a   :  { %437 = vmatpush3.bf16.msra.mxu1 %v436_v9  ;;  %v142_v20 = vld [vmem:[#allocation7 + $0xb8] sm:$0xff]  ;;  %v151_v21 = vld [vmem:[#allocation7 + $0x100] sm:$0xff]  ;;  %v152_v22 = vld [vmem:[#allocation7 + $0x108] sm:$0xff]  ;;  %v444_v23 = vpack.c.bf16 %v124_v18, %v123_v17 }
  0x3b   :  { %439 = vmatprep.subr.bf16.mxu1 %v438_v10  ;;  %v125_v24 = vld [vmem:[#allocation7 + $0x30] sm:$0xff]  ;;  %v426_v25 = vpack.c.bf16 %v152_v22, %v151_v21  ;;  %v446_v26 = vpack.c.bf16 %v142_v20, %v141_v19  ;;  %v126_v27 = vld [vmem:[#allocation7 + $0x38] sm:$0xff]  ;;  %v143_v30 = vld [vmem:[#allocation7 + $0xc0] sm:$0xff] }
  0x3c   :  { %v153_v28 = vld [vmem:[#allocation7 + $0x110] sm:$0xff]  ;;  %v154_v29 = vld [vmem:[#allocation7 + $0x118] sm:$0xff]  ;;  %v144_v31 = vld [vmem:[#allocation7 + $0xc8] sm:$0xff]  ;;  %v448_v35 = vpack.c.bf16 %v126_v27, %v125_v24 }
  0x3d   :  { %427 = vmatpush3.bf16.msra.mxu0 %v426_v25  ;;  %v429_v32 = vpack.c.bf16 %v154_v29, %v153_v28  ;;  %v155_v33 = vld [vmem:[#allocation7 + $0x120] sm:$0xff]  ;;  %v156_v34 = vld [vmem:[#allocation7 + $0x128] sm:$0xff]  ;;  %v56_v37 = vld [vmem:[#allocation3 + $0x8] sm:$0xff]  ;;  %v450_v38 = vpack.c.bf16 %v144_v31, %v143_v30 }
  0x3e   :  { %441 = vmatpush3.bf16.msra.mxu1 %v440_v15  ;;  %428 = vmatprep.subr.bf16.mxu0 %v561_v0  ;;  %v127_v36 = vld [vmem:[#allocation7 + $0x40] sm:$0xff]  ;;  %v128_v39 = vld [vmem:[#allocation7 + $0x48] sm:$0xff]  ;;  %v64_v40 = vrot.slane %v56_v37, 4  ;;  %v57_v42 = vld [vmem:[#allocation5] sm:$0xff]  ;;  %v432_v45 = vpack.c.bf16 %v156_v34, %v155_v33 }
  0x3f   :  { %443 = vmatprep.subr.bf16.mxu1 %v442_v16  ;;  %v55_v41 = vld [vmem:[#allocation3] sm:$0xff]  ;;  %v145_v43 = vld [vmem:[#allocation7 + $0xd0] sm:$0xff]  ;;  %v146_v44 = vld [vmem:[#allocation7 + $0xd8] sm:$0xff]  ;;  %v98_v47 = vsel %vm97_vm1, %v57_v42, 0.0  ;;  %v452_v50 = vpack.c.bf16 %v128_v39, %v127_v36 }
  0x40   :  { %v58_v46 = vrot.slane %v55_v41, 4  ;;  %v65_v48 = vadd.f32 %v64_v40, %v56_v37  ;;  %v99_v49 = vrot.slane %v98_v47, 4  ;;  %v454_v52 = vpack.c.bf16 %v146_v44, %v145_v43  ;;  %v129_v53 = vld [vmem:[#allocation7 + $0x50] sm:$0xff]  ;;  %v130_v54 = vld [vmem:[#allocation7 + $0x58] sm:$0xff]  ;;  %v147_v57 = vld [vmem:[#allocation7 + $0xe0] sm:$0xff] }
  0x41   :  { %430 = vmatpush3.bf16.msra.mxu0 %v429_v32  ;;  %v148_v58 = vld [vmem:[#allocation7 + $0xe8] sm:$0xff]  ;;  %v157_v61 = vld [vmem:[#allocation7 + $0x130] sm:$0xff]  ;;  %v456_v63 = vpack.c.bf16 %v130_v54, %v129_v53  ;;  %v131_v3 = vld [vmem:[#allocation7 + $0x60] sm:$0xff] }
  0x42   :  { %445 = vmatpush3.bf16.msra.mxu1 %v444_v23  ;;  %431 = vmatprep.subr.bf16.mxu0 %v561_v0  ;;  %v59_v51 = vadd.f32 %v58_v46, %v55_v41  ;;  %v66_v55 = vrot.slane %v65_v48, 2  ;;  %v100_v56 = vadd.f32 %v99_v49, %v98_v47  ;;  %v458_v2 = vpack.c.bf16 %v148_v58, %v147_v57  ;;  %v132_v4 = vld [vmem:[#allocation7 + $0x68] sm:$0xff]  ;;  %v149_v7 = vld [vmem:[#allocation7 + $0xf0] sm:$0xff]  ;;  %v150_v8 = vld [vmem:[#allocation7 + $0xf8] sm:$0xff] }
  0x43   :  { %447 = vmatprep.subr.bf16.mxu1 %v446_v26  ;;  %v460_v12 = vpack.c.bf16 %v132_v4, %v131_v3  ;;  %v462_v13 = vpack.c.bf16 %v150_v8, %v149_v7  ;;  %v133_v14 = vld [vmem:[#allocation7 + $0x70] sm:$0xff]  ;;  %v134_v15 = vld [vmem:[#allocation7 + $0x78] sm:$0xff] }
  0x44   :  { %v60_v59 = vrot.slane %v59_v51, 2  ;;  %v67_v60 = vadd.f32 %v66_v55, %v65_v48  ;;  %v101_v62 = vrot.slane %v100_v56, 2  ;;  %v464_v21 = vpack.c.bf16 %v134_v15, %v133_v14 }
  0x45   :  { %433 = vmatpush3.bf16.msra.mxu0 %v432_v45 }
  0x46   :  { %449 = vmatpush3.bf16.msra.mxu1 %v448_v35  ;;  %420 = vmatprep.subr.mxu0 %v563_v1  ;;  %v61_v0 = vadd.f32 %v60_v59, %v59_v51  ;;  %v68_v5 = vrot.slane %v67_v60, 1  ;;  %v102_v6 = vadd.f32 %v101_v62, %v100_v56  ;;  %v364_v62 = vld [vmem:[#allocation7 + $0x138] ss:$0 sm:$0xff] }
  0x47   :  { %451 = vmatprep.subr.bf16.mxu1 %v450_v38 }
  0x48   :  { %v62_v9 = vrot.slane %v61_v0, 1  ;;  %v69_v10 = vadd.f32 %v68_v5, %v67_v60  ;;  %v103_v11 = vrot.slane %v102_v6, 1 }
  0x49   :  { %421 = vmatpush3.msra.mxu0 %v157_v61 }
  0x4a   :  { %453 = vmatpush3.bf16.msra.mxu1 %v452_v50  ;;  %v63_v1 = vadd.f32 %v62_v9, %v61_v0  ;;  %v72_v16 = vmul.f32 0.125, %v69_v10  ;;  %v104_v17 = vadd.f32 %v103_v11, %v102_v6 }
  0x4b   :  { %455 = vmatprep.subr.bf16.mxu1 %v454_v52 }
  0x4c   :  { %v71_v18 = vmul.f32 0.125, %v63_v1  ;;  %v74_v19 = vsub.f32 %v56_v37, %v72_v16  ;;  %v105_v20 = vmul.f32 0.125, %v104_v17 }
  0x4e   :  { %457 = vmatpush3.bf16.msra.mxu1 %v456_v63  ;;  %v73_v22 = vsub.f32 %v55_v41, %v71_v18  ;;  %v76_v23 = vmul.f32 %v74_v19, %v74_v19  ;;  %v106_v24 = vsub.f32 %v57_v42, %v105_v20 }
  0x4f   :  { %459 = vmatprep.subr.bf16.mxu1 %v458_v2 }
  0x50   :  { %v75_v25 = vmul.f32 %v73_v22, %v73_v22  ;;  %v83_v26 = vrot.slane %v76_v23, 4  ;;  %v107_v27 = vmul.f32 %v106_v24, %v106_v24 }
  0x52   :  { %461 = vmatpush3.bf16.msra.mxu1 %v460_v12  ;;  %v77_v28 = vrot.slane %v75_v25, 4  ;;  %v84_v29 = vadd.f32 %v83_v26, %v76_v23  ;;  %v108_v30 = vsel %vm97_vm1, %v107_v27, 0.0  ;;  %v328_v26 = vld [vmem:[#allocation7 + $0x139] sm:$0x1] }
  0x53   :  { %463 = vmatprep.subr.bf16.mxu1 %v462_v13  ;;  %v109_v32 = vrot.slane %v108_v30, 4 }
  0x54   :  { %v78_v31 = vadd.f32 %v77_v28, %v75_v25  ;;  %v85_v33 = vrot.slane %v84_v29, 2 }
  0x55   :  { %v110_v35 = vadd.f32 %v109_v32, %v108_v30 }
  0x56   :  { %465 = vmatpush3.bf16.msra.mxu1 %v464_v21  ;;  %v79_v34 = vrot.slane %v78_v31, 2  ;;  %v86_v36 = vadd.f32 %v85_v33, %v84_v29 }
  0x57   :  { %v111_v38 = vrot.slane %v110_v35, 2 }
  0x58   :  { %v80_v37 = vadd.f32 %v79_v34, %v78_v31  ;;  %v87_v39 = vrot.slane %v86_v36, 1 }
  0x59   :  { %v112_v41 = vadd.f32 %v111_v38, %v110_v35 }
  0x5a   :  { %v81_v40 = vrot.slane %v80_v37, 1  ;;  %v88_v42 = vadd.f32 %v87_v39, %v86_v36 }
  0x5b   :  { %v113_v44 = vrot.slane %v112_v41, 1 }
  0x5c   :  { %v82_v43 = vadd.f32 %v81_v40, %v80_v37  ;;  %v90_v45 = vmul.f32 0.125, %v88_v42 }
  0x5d   :  { %v114_v47 = vadd.f32 %v113_v44, %v112_v41 }
  0x5e   :  { %v89_v46 = vmul.f32 0.125, %v82_v43  ;;  %v92_v48 = vadd.f32 1e-05, %v90_v45 }
  0x5f   :  { %v115_v50 = vmul.f32 0.125, %v114_v47 }
  0x60   :  { %v91_v49 = vadd.f32 1e-05, %v89_v46  ;;  %476 = vrsqrt.f32 %v92_v48 }
  0x61   :  { %v116_v51 = vadd.f32 1e-05, %v115_v50 }
  0x62   :  { %478 = vrsqrt.f32 %v91_v49 }
  0x63   :  { %480 = vrsqrt.f32 %v116_v51 }
  0x6a   :  { %v477_v52 = vpop.eup %476 }
  0x6b   :  { %v96_v54 = vmul.f32 %v477_v52, %v74_v19 }
  0x6c   :  { %v479_v53 = vpop.eup %478 }
  0x6d   :  { %v95_v55 = vmul.f32 %v479_v53, %v73_v22  ;;  %v481_v56 = vpop.eup %480  ;;  %295 = vmatprep.mubr.f32.mxu1 %v96_v54 }
  0x6e   :  { %v118_v57 = vmul.f32 %v481_v56, %v106_v24  ;;  %v346_v24 = vlaneseq }
  0x6f   :  { %296 = vmatmul.mubr.f32.vlgmr.msra.gmra.mrb[0].mxu1 %v95_v55 }
  0x70   :  { %423 = vmatmul.mubr.msk.f32.vlgmr.msra.gmra.mrb[0].mxu0 %vm97_vm1, %v118_v57  ;;  %v347_v25 = vshrl.u32 %v346_v24, 7 }
  0x72   :  { %v348_v28 = vsub.s32 0, %v347_v25 }
 0x142   :  { %v405_v58 = vpop.f32.mrb[0].mxu1 }
 0x143   :  { %v406_v59 = vpop.f32.mrb[1].mxu1  ;;  %v227_v61 = vpop.f32.mrb[0].mxu0 }
 0x144   :  { %v407_v60 = vadd.f32 %v406_v59, %v405_v58  ;;  %v424_v63 = vpop.f32.mrb[1].mxu0 }
 0x146   :  { %v298_v0 = vadd.f32 %v407_v60, %v227_v61 }
 0x148   :  { %v306_v2 = vadd.f32 %v364_v62, %v298_v0 }
 0x14a   :  { %v308_v3 = vmul.f32 0.70710677, %v306_v2  ;;  %v307_v5 = vmul.f32 0.5, %v306_v2 }
 0x14c   :  { %482 = verf.f32 %v308_v3 }
 0x156   :  { %v483_v4 = vpop.eup %482 }
 0x157   :  { %v310_v6 = vadd.f32 1.0, %v483_v4 }
 0x159   :  { %v311_v7 = vmul.f32 %v310_v6, %v307_v5 }
 0x15b   :  { %v312_v8 = vrot.slane %v311_v7, 4 }
 0x15d   :  { %v313_v9 = vadd.f32 %v312_v8, %v311_v7 }
 0x15f   :  { %v314_v10 = vrot.slane %v313_v9, 2 }
 0x161   :  { %v315_v11 = vadd.f32 %v314_v10, %v313_v9 }
 0x163   :  { %v316_v12 = vrot.slane %v315_v11, 1 }
 0x165   :  { %v317_v1 = vadd.f32 %v316_v12, %v315_v11 }
 0x167   :  { %v318_v13 = vmul.f32 0.125, %v317_v1 }
 0x169   :  { %v319_v14 = vsub.f32 %v311_v7, %v318_v13 }
 0x16b   :  { %v320_v15 = vmul.f32 %v319_v14, %v319_v14 }
 0x16d   :  { %v321_v16 = vrot.slane %v320_v15, 4 }
 0x16f   :  { %v322_v17 = vadd.f32 %v321_v16, %v320_v15 }
 0x171   :  { %v323_v18 = vrot.slane %v322_v17, 2 }
 0x173   :  { %v324_v19 = vadd.f32 %v323_v18, %v322_v17 }
 0x175   :  { %v325_v20 = vrot.slane %v324_v19, 1 }
 0x177   :  { %v326_v21 = vadd.f32 %v325_v20, %v324_v19 }
 0x179   :  { %v327_v22 = vmul.f32 0.125, %v326_v21 }
 0x17b   :  { %v329_v23 = vadd.f32 1e-05, %v327_v22 }
 0x17d   :  { %484 = vrsqrt.f32 %v329_v23 }
 0x187   :  { %v485_v27 = vpop.eup %484 }
 0x188   :  { %v331_v29 = vmul.f32 %v485_v27, %v328_v26 }
 0x18a   :  { %v333_v30 = vmul.f32 %v331_v29, %v318_v13  ;;  %v349_v31 = vrot.slane %v331_v29, %v348_v28 }
 0x18c   :  { %v335_v32 = vsel %vm334_vm2, %v333_v30, 0.0  ;;  %v350_v33 = vmul.f32 %v349_v31, %v311_v7 }
 0x18d   :  { %336 = vadd.xlane.f32.xlu0 %v335_v32 }
 0x191   :  { %351 = vadd.xlane.f32.xlu0 %v350_v33 }
 0x21a   :  { %v337_v34 = vpop.xlane.xlu0 %336 }
 0x21b   :  { %v338_v35 = vrot.slane %v337_v34, 4 }
 0x21d   :  { %v339_v36 = vadd.f32 %v338_v35, %v337_v34 }
 0x21e   :  { %v352_v41 = vpop.xlane.xlu0 %351 }
 0x21f   :  { %v340_v37 = vrot.slane %v339_v36, 2 }
 0x221   :  { %v341_v38 = vadd.f32 %v340_v37, %v339_v36 }
 0x223   :  { %v342_v39 = vrot.slane %v341_v38, 1 }
 0x225   :  { %v343_v40 = vadd.f32 %v342_v39, %v341_v38 }
 0x227   :  { %466 = vpush %v343_v40 }
 0x258   :  { %s467_s2 = spop %466 }
 0x259   :  { %s345_s27 = ssub.f32 %s639_s3, %s467_s2 }
 0x25b   :  { %v353_v42 = vstv %s345_s27 }
 0x25c   :  { %v354_v43 = vadd.f32 %v353_v42, %v352_v41 }
 0x25e   :  { %356 = vst.msk [vmem:[%s640_s4] sm:$0xff] %vm355_vm3, %v354_v43 }
 0x25f   :  { %361 = vsyncpa [#allocation4], 1 }
 0x260   :  { %362 = vsyncpa [#allocation6], 1 }

</bundles_post_ra>
